<compile_context>
chip_gen: v5e
topology: v5e:2x2
jax: 0.10.0
libtpu: 0.0.40
codegen_flags: <defaults>
</compile_context>

<pallas_src>
import functools
import math

import jax
import jax.numpy as jnp
from jax.experimental import pallas as pl
from jax.experimental.pallas import tpu as pltpu

# ----------------------------------------------------------------------------
# constants mirroring the PyTorch module defaults
# ----------------------------------------------------------------------------
DIM = 28
STAGE = 2
NUM_BLOCKS = (2, 2, 2)
PATCH = (8, 8)                 # SAH_MSA patch size
ATTN = PATCH[0] * PATCH[1]     # 64 tokens per attention bucket
WIN = 2 * PATCH[0]             # 16x16 spatial window inside SAHAB
N_ROUNDS = 2
R_LSH = 1.0


def _default_vmem_limit():
    # ~3/4 of physical VMEM: ~48 MiB on v7x (64 MiB), ~96 MiB on v5e/v6e (128 MiB).
    try:
        cap = getattr(pltpu.get_tpu_info(), "vmem_capacity_bytes", None)
        if cap:
            return int(cap) * 3 // 4
    except Exception:
        pass
    return 48 * 1024 * 1024


VMEM_LIMIT = _default_vmem_limit()


def _act(y, act):
    """Elementwise epilogue fused inside kernels (f32 math)."""
    if act == "none":
        return y
    if act == "relu":
        return jnp.maximum(y, 0.0)
    if act == "lrelu":
        return jnp.where(y >= 0, y, 0.1 * y)
    raise ValueError(f"unknown activation {act!r}")


def _row_tiles(h):
    for n in (4, 2):
        if h % n == 0 and h // n >= 8:
            return n
    return 1


# ----------------------------------------------------------------------------
# Pallas kernel 1: matmul  (M,K) @ (K,N) -> (M,N)  + fused epilogue
#   bf16 MXU inputs, f32 accumulation; K and N are full-extent blocks
#   (channel dims in this model are <= ~1K) so only M is tiled.
# ----------------------------------------------------------------------------
def _mm_kernel(a_ref, b_ref, o_ref, *, act):
    y = jnp.dot(a_ref[...], b_ref[...], preferred_element_type=jnp.float32)
    o_ref[...] = _act(y, act).astype(o_ref.dtype)


def _choose_tm(m):
    if m < 256:
        return m               # single full-M block (always layout-legal)
    for t in (1024, 512, 256, 128):
        if m % t == 0 and m // t >= 2:     # keep grid >= 2 for v7x megacore
            return t
    return 256                 # fall back to padding M


def pallas_matmul(a, b, act="none", out_dtype=jnp.float32):
    M, K = a.shape
    K2, N = b.shape
    assert K == K2
    a = a.astype(jnp.bfloat16)
    b = b.astype(jnp.bfloat16)
    TM = _choose_tm(M)
    Mp = -(-M // TM) * TM
    a_p = a if Mp == M else jnp.pad(a, ((0, Mp - M), (0, 0)))
    out = pl.pallas_call(
        functools.partial(_mm_kernel, act=act),
        out_shape=jax.ShapeDtypeStruct((Mp, N), out_dtype),
        grid_spec=pltpu.PrefetchScalarGridSpec(
            num_scalar_prefetch=0,
            grid=(Mp // TM,),
            in_specs=[pl.BlockSpec((TM, K), lambda i: (i, 0)),
                      pl.BlockSpec((K, N), lambda i: (0, 0))],
            out_specs=pl.BlockSpec((TM, N), lambda i: (i, 0))),
        compiler_params=pltpu.CompilerParams(
            dimension_semantics=("parallel",),
            vmem_limit_bytes=VMEM_LIMIT),
    )(a_p, b)
    return out if Mp == M else out[:M]


# ----------------------------------------------------------------------------
# Pallas kernel 2: dense (dilated) 3x3 convolution, padding = dilation.
#   Tap-accumulated in-kernel matmuls: the padded map stays resident in VMEM
#   (block index depends only on b), output row tiles are pipelined out.
#   No im2col tensor is ever materialized in HBM.
# ----------------------------------------------------------------------------
def _conv3x3_kernel(x_ref, w_ref, o_ref, *, dilation, act):
    TH, W, Cout = o_ref.shape[1], o_ref.shape[2], o_ref.shape[3]
    Cin = x_ref.shape[3]
    d = dilation
    row0 = pl.multiple_of(pl.program_id(1) * TH, 8)
    acc = jnp.zeros((TH * W, Cout), jnp.float32)
    for dh in range(3):
        for dw in range(3):
            tap = x_ref[0, pl.ds(row0 + dh * d, TH), pl.ds(dw * d, W), :]
            acc = acc + jnp.dot(tap.reshape(TH * W, Cin), w_ref[dh, dw],
                                preferred_element_type=jnp.float32)
    o_ref[0] = _act(acc, act).astype(o_ref.dtype).reshape(TH, W, Cout)


def pallas_conv3x3(x, w, dilation=1, act="none", out_dtype=jnp.float32):
    # x: [B,H,W,Cin] NHWC, w: [Cout,Cin,3,3] (PyTorch layout), padding=dilation
    B, H, W, Cin = x.shape
    Cout = w.shape[0]
    d = dilation
    xp = jnp.pad(x.astype(jnp.bfloat16), ((0, 0), (d, d), (d, d), (0, 0)))
    wk = jnp.transpose(w, (2, 3, 1, 0)).astype(jnp.bfloat16)    # [3,3,Cin,Cout]
    nT = _row_tiles(H)
    TH = H // nT
    return pl.pallas_call(
        functools.partial(_conv3x3_kernel, dilation=d, act=act),
        out_shape=jax.ShapeDtypeStruct((B, H, W, Cout), out_dtype),
        grid_spec=pltpu.PrefetchScalarGridSpec(
            num_scalar_prefetch=0,
            grid=(B, nT),
            in_specs=[pl.BlockSpec((1, H + 2 * d, W + 2 * d, Cin),
                                   lambda b, t: (b, 0, 0, 0)),
                      pl.BlockSpec((3, 3, Cin, Cout), lambda b, t: (0, 0, 0, 0))],
            out_specs=pl.BlockSpec((1, TH, W, Cout), lambda b, t: (b, t, 0, 0))),
        compiler_params=pltpu.CompilerParams(
            dimension_semantics=("parallel", "parallel"),
            vmem_limit_bytes=VMEM_LIMIT),
    )(xp, wk)


# ----------------------------------------------------------------------------
# Pallas kernel 3: depthwise 3x3 convolution (pad 1), bf16 I/O, f32 accumulate,
#   fused activation.
#   stride 1: grid=(B, H/TH), both axes parallel; the padded map is resident
#             across row tiles (its block index only depends on b).
#   stride 2: direct strided output via a 4-phase (even/odd row/col)
#             decomposition; the kernel does only unit-stride reads.
# ----------------------------------------------------------------------------
def _dw_s1_kernel(x_ref, w_ref, o_ref, *, act):
    TH, W, C = o_ref.shape[1], o_ref.shape[2], o_ref.shape[3]
    row0 = pl.multiple_of(pl.program_id(1) * TH, 8)
    acc = jnp.zeros((TH, W, C), jnp.float32)
    # TODO(synk): load one aligned (TH, W+2, C) slab per dh and realize the dw
    # shifts with pltpu.roll on the sublane axis to cut vld/realign pressure.
    for dh in range(3):
        for dw in range(3):
            tap = x_ref[0, pl.ds(row0 + dh, TH), pl.ds(dw, W), :]
            acc = acc + tap.astype(jnp.float32) * w_ref[dh, dw]
    o_ref[0] = _act(acc, act).astype(o_ref.dtype)


def _dw_s2_kernel(ee_ref, eo_ref, oe_ref, oo_ref, w_ref, o_ref, *, act):
    Ho, Wo, C = o_ref.shape[1], o_ref.shape[2], o_ref.shape[3]
    ee = ee_ref[0].astype(jnp.float32)
    eo = eo_ref[0].astype(jnp.float32)
    oe = oe_ref[0].astype(jnp.float32)
    oo = oo_ref[0].astype(jnp.float32)
    # out[i,j] = sum_{dh,dw} xp[2i+dh, 2j+dw] * w[dh,dw]
    acc = ee[:Ho, :Wo, :] * w_ref[0, 0]
    acc = acc + eo[:Ho, :Wo, :] * w_ref[0, 1]
    acc = acc + ee[:Ho, 1:Wo + 1, :] * w_ref[0, 2]
    acc = acc + oe[:Ho, :Wo, :] * w_ref[1, 0]
    acc = acc + oo[:Ho, :Wo, :] * w_ref[1, 1]
    acc = acc + oe[:Ho, 1:Wo + 1, :] * w_ref[1, 2]
    acc = acc + ee[1:Ho + 1, :Wo, :] * w_ref[2, 0]
    acc = acc + eo[1:Ho + 1, :Wo, :] * w_ref[2, 1]
    acc = acc + ee[1:Ho + 1, 1:Wo + 1, :] * w_ref[2, 2]
    o_ref[0] = _act(acc, act).astype(o_ref.dtype)


def pallas_depthwise3x3(x, w, stride=1, act="none", out_dtype=jnp.float32):
    # x: [B,H,W,C] (NHWC), w: [3,3,C], padding=1
    B, H, W, C = x.shape
    w = w.astype(jnp.float32)
    xp = jnp.pad(x.astype(jnp.bfloat16), ((0, 0), (1, 1), (1, 1), (0, 0)))
    if stride == 1:
        nT = _row_tiles(H)
        TH = H // nT
        return pl.pallas_call(
            functools.partial(_dw_s1_kernel, act=act),
            out_shape=jax.ShapeDtypeStruct((B, H, W, C), out_dtype),
            grid_spec=pltpu.PrefetchScalarGridSpec(
                num_scalar_prefetch=0,
                grid=(B, nT),
                in_specs=[pl.BlockSpec((1, H + 2, W + 2, C),
                                       lambda b, t: (b, 0, 0, 0)),
                          pl.BlockSpec((3, 3, C), lambda b, t: (0, 0, 0))],
                out_specs=pl.BlockSpec((1, TH, W, C),
                                       lambda b, t: (b, t, 0, 0))),
            compiler_params=pltpu.CompilerParams(
                dimension_semantics=("parallel", "parallel"),
                vmem_limit_bytes=VMEM_LIMIT),
        )(xp, w)

    assert stride == 2 and H % 2 == 0 and W % 2 == 0
    Ho, Wo = H // 2, W // 2
    # TODO(synk): extract the 4 phases inside the kernel (strided VMEM reads)
    # to avoid this extra (small, bf16) HBM pass.
    ee = xp[:, 0::2, 0::2, :]          # (B, Ho+1, Wo+1, C)
    eo = xp[:, 0::2, 1::2, :]
    oe = xp[:, 1::2, 0::2, :]
    oo = xp[:, 1::2, 1::2, :]
    phase_spec = pl.BlockSpec((1, Ho + 1, Wo + 1, C), lambda b: (b, 0, 0, 0))
    return pl.pallas_call(
        functools.partial(_dw_s2_kernel, act=act),
        out_shape=jax.ShapeDtypeStruct((B, Ho, Wo, C), out_dtype),
        grid_spec=pltpu.PrefetchScalarGridSpec(
            num_scalar_prefetch=0,
            grid=(B,),
            in_specs=[phase_spec, phase_spec, phase_spec, phase_spec,
                      pl.BlockSpec((3, 3, C), lambda b: (0, 0, 0))],
            out_specs=pl.BlockSpec((1, Ho, Wo, C), lambda b: (b, 0, 0, 0))),
        compiler_params=pltpu.CompilerParams(
            dimension_semantics=("parallel",),
            vmem_limit_bytes=VMEM_LIMIT),
    )(ee, eo, oe, oo, w)


# ----------------------------------------------------------------------------
# Pallas kernel 4: bucketed attention (softmax(QK^T) V) + logsumexp output.
#   Up to GB=32 buckets per grid step (batched einsums, grid kept >= 2);
#   bf16 attention output, lane-dense f32 lse.
# ----------------------------------------------------------------------------
def _attn_kernel(q_ref, k_ref, v_ref, o_ref, lse_ref):
    q = q_ref[...]            # (GB, L, D) bf16
    k = k_ref[...]
    v = v_ref[...]
    s = jnp.einsum('bqd,bkd->bqk', q, k,
                   preferred_element_type=jnp.float32)             # (GB, L, L)
    m = jnp.max(s, axis=-1, keepdims=True)
    p = jnp.exp(s - m)
    l = jnp.sum(p, axis=-1, keepdims=True)
    lse_ref[...] = jnp.squeeze(m + jnp.log(l), axis=-1)             # (GB, L)
    dots = p * pl.reciprocal(l, approx=True)                        # exp(s - lse)
    o = jnp.einsum('bqk,bkd->bqd', dots.astype(v.dtype), v,
                   preferred_element_type=jnp.float32)
    o_ref[...] = o.astype(o_ref.dtype)


def _choose_gb(g):
    for gb in (32, 16, 8, 4, 2):
        if g % gb == 0 and g // gb >= 2:      # keep grid >= 2 for v7x megacore
            return gb
    return g


def pallas_block_attention(q, k, v):
    G, L, D = q.shape
    GB = _choose_gb(G)
    q = q.astype(jnp.bfloat16)
    k = k.astype(jnp.bfloat16)
    v = v.astype(jnp.bfloat16)
    qkv_spec = pl.BlockSpec((GB, L, D), lambda g: (g, 0, 0))
    out, lse = pl.pallas_call(
        _attn_kernel,
        out_shape=(jax.ShapeDtypeStruct((G, L, D), jnp.bfloat16),
                   jax.ShapeDtypeStruct((G, L), jnp.float32)),
        grid_spec=pltpu.PrefetchScalarGridSpec(
            num_scalar_prefetch=0,
            grid=(G // GB,),
            in_specs=[qkv_spec, qkv_spec, qkv_spec],
            out_specs=[pl.BlockSpec((GB, L, D), lambda g: (g, 0, 0)),
                       pl.BlockSpec((GB, L), lambda g: (g, 0))]),
        compiler_params=pltpu.CompilerParams(
            dimension_semantics=("parallel",),
            vmem_limit_bytes=VMEM_LIMIT),
    )(q, k, v)
    return out, lse


# ----------------------------------------------------------------------------
# conv / elementwise helpers built on the Pallas kernels (NHWC)
# ----------------------------------------------------------------------------
def conv1x1(x, w, act="none", out_dtype=jnp.float32):     # w: [Cin, Cout]
    B, H, W, C = x.shape
    return pallas_matmul(x.reshape(-1, C), w, act=act,
                         out_dtype=out_dtype).reshape(B, H, W, w.shape[1])


def conv3x3(x, w, dilation=1, act="none", out_dtype=jnp.float32):
    return pallas_conv3x3(x, w, dilation=dilation, act=act, out_dtype=out_dtype)


def conv4x4_s2(x, w):                    # w: [Cout, Cin, 4, 4], stride 2, pad 1
    # im2col here is small (output at half resolution); built in bf16.
    B, H, W, Cin = x.shape
    Cout = w.shape[0]
    Ho, Wo = H // 2, W // 2
    xp = jnp.pad(x.astype(jnp.bfloat16), ((0, 0), (1, 1), (1, 1), (0, 0)))
    cols = []
    for di in range(4):
        for dj in range(4):
            cols.append(xp[:, di:di + 2 * Ho - 1:2, dj:dj + 2 * Wo - 1:2, :])
    col = jnp.concatenate(cols, axis=-1).reshape(-1, 16 * Cin)
    wmat = jnp.transpose(w, (2, 3, 1, 0)).reshape(16 * Cin, Cout)
    return pallas_matmul(col, wmat).reshape(B, Ho, Wo, Cout)


def conv_transpose2x2_s2(x, w, b):       # w: [Cin, Cout, 2, 2], b: [Cout]
    B, H, W, Cin = x.shape
    Cout = w.shape[1]
    y = pallas_matmul(x.reshape(-1, Cin), w.reshape(Cin, Cout * 4))
    y = y.reshape(B, H, W, Cout, 2, 2)
    y = jnp.transpose(y, (0, 1, 4, 2, 5, 3)).reshape(B, 2 * H, 2 * W, Cout)
    return y + b


def avgpool2(x):
    B, H, W, C = x.shape
    return x.reshape(B, H // 2, 2, W // 2, 2, C).mean(axis=(2, 4))


def gelu(x):
    # TODO(synk): fuse exact-erf gelu into the matmul/depthwise epilogue once
    # erf lowering in Mosaic is verified; kept as a (bf16-traffic) XLA op here.
    return jax.nn.gelu(x.astype(jnp.float32), approximate=False).astype(x.dtype)


def layernorm(x, g, b, eps=1e-5):
    mu = jnp.mean(x, axis=-1, keepdims=True)
    var = jnp.mean((x - mu) ** 2, axis=-1, keepdims=True)
    return (x - mu) / jnp.sqrt(var + eps) * g + b


# ----------------------------------------------------------------------------
# deterministic parameter initialization
# ----------------------------------------------------------------------------
_INIT_KEY = [jax.random.PRNGKey(1234)]


def _rand(shape, scale):
    _INIT_KEY[0], k = jax.random.split(_INIT_KEY[0])
    return scale * jax.random.normal(k, shape, dtype=jnp.float32)


def init_ffn(dim):
    hid = dim * 4
    return {'w1': _rand((dim, hid), 1.0 / math.sqrt(dim)),
            'wd': _rand((3, 3, hid), 1.0 / 3.0),
            'w2': _rand((hid, dim), 1.0 / math.sqrt(hid))}


def init_sah_msa(c):
    inner = 3 * c
    return {'to_q': _rand((c, inner), 0.02),
            'to_k': _rand((c, inner), 0.02),
            'to_v': _rand((c, inner), 0.02),
            'to_out': _rand((inner, c), 0.02)}


def init_sahab(dim):
    return {'ln1_g': jnp.ones((dim,), jnp.float32), 'ln1_b': jnp.zeros((dim,), jnp.float32),
            'attn': init_sah_msa(dim),
            'ln2_g': jnp.ones((dim,), jnp.float32), 'ln2_b': jnp.zeros((dim,), jnp.float32),
            'ffn': init_ffn(dim)}


def init_sahabs(dim, num_blocks):
    return [init_sahab(dim) for _ in range(num_blocks)]


def init_aspp(cin, rates, cout):
    return {'convs': [_rand((cout, cin, 3, 3), 1.0 / math.sqrt(cin * 9)) for _ in rates],
            'rates': list(rates),
            'pool_w': _rand((cin, cout), 1.0 / math.sqrt(cin)),
            'proj_w': _rand(((len(rates) + 1) * cout, cout),
                            1.0 / math.sqrt((len(rates) + 1) * cout))}


def init_se(dim=28, expand=2):
    p = {'in_proj': _rand((28, dim), 1.0 / math.sqrt(28))}
    enc = []
    ds = dim
    for _ in range(2):
        enc.append({'c1': _rand((ds, ds * expand), 1.0 / math.sqrt(ds)),
                    'dw': _rand((3, 3, ds * expand), 1.0 / 3.0),
                    'c3': _rand((ds * expand, ds * expand), 1.0 / math.sqrt(ds * expand))})
        ds *= 2
    p['enc'] = enc
    p['aspp'] = init_aspp(ds, (3, 6), ds)
    dec = []
    for _ in range(2):
        dec.append({'up_w': _rand((ds, ds // 2, 2, 2), 1.0 / math.sqrt(ds * 4)),
                    'up_b': jnp.zeros((ds // 2,), jnp.float32),
                    'c1': _rand((ds // 2, ds), 1.0 / math.sqrt(ds // 2)),
                    'dw': _rand((3, 3, ds), 1.0 / 3.0),
                    'c3': _rand((ds, ds // 2), 1.0 / math.sqrt(ds))})
        ds //= 2
    p['dec'] = dec
    p['out_w'] = _rand((dim, dim, 3, 3), 1.0 / math.sqrt(dim * 9))
    return p


def init_cst(dim=DIM, stage=STAGE, num_blocks=NUM_BLOCKS):
    p = {'fution': _rand((56, dim), 1.0 / math.sqrt(56)),
         'fe': init_se(dim=28, expand=2)}
    enc = []
    ds = dim
    for i in range(stage):
        enc.append({'block': init_sahabs(ds, num_blocks[i]),
                    'down_w': _rand((ds * 2, ds, 4, 4), 1.0 / math.sqrt(ds * 16))})
        ds *= 2
    p['enc'] = enc
    p['bottleneck'] = init_sahabs(ds, num_blocks[-1])
    dec = []
    for i in range(stage):
        dec.append({'up_w': _rand((ds, ds // 2, 2, 2), 1.0 / math.sqrt(ds * 4)),
                    'up_b': jnp.zeros((ds // 2,), jnp.float32),
                    'block': init_sahabs(ds // 2, num_blocks[stage - 1 - i])})
        ds //= 2
    p['dec'] = dec
    p['out_proj'] = _rand((dim, dim, 3, 3), 1.0 / math.sqrt(dim * 9))
    return p


# ----------------------------------------------------------------------------
# forward passes
# ----------------------------------------------------------------------------
def ffn_apply(p, x):
    h = gelu(conv1x1(x, p['w1'], out_dtype=jnp.bfloat16))
    h = gelu(pallas_depthwise3x3(h, p['wd'], stride=1, out_dtype=jnp.bfloat16))
    return conv1x1(h, p['w2'])


def sah_msa_apply(p, x, heads, key):
    """x: [B, N, c] tokens (N = 256); LSH-bucketed multi-round attention."""
    B, N, c = x.shape
    inner = 3 * c
    # fused QKV projection: x is read once, lane-dense bf16 output slab
    w_qkv = jnp.concatenate([p['to_q'], p['to_k'], p['to_v']], axis=1)   # (c, 3*inner)
    qkv = pallas_matmul(x.reshape(-1, c), w_qkv,
                        out_dtype=jnp.bfloat16).reshape(B, N, 3 * inner)
    q = qkv[..., :inner]
    k = qkv[..., inner:2 * inner]
    v = qkv[..., 2 * inner:]

    e = c // heads
    bs = B * heads
    xh = x.reshape(B, N, heads, e).transpose(0, 2, 1, 3).reshape(bs, N, e)

    # XBOX+ asymmetric transform
    x_norms = jnp.linalg.norm(xh, axis=-1, keepdims=True)
    MX = jnp.max(x_norms, axis=-2, keepdims=True)
    ext = jnp.sqrt(jnp.maximum(MX ** 2 - x_norms ** 2, 0.0))
    Xs = jnp.concatenate([xh, ext, jnp.zeros_like(x_norms)], axis=-1)

    # SALSH: fresh random projections every call (as in the reference).
    # N_out = 2 columns -> tiny GEMV, plain XLA (Pallas would be pure overhead).
    k_a, k_b = jax.random.split(key)
    alpha = jax.random.normal(k_a, (e + 2, N_ROUNDS), dtype=jnp.float32)
    beta = jax.random.uniform(k_b, (1, N_ROUNDS), minval=0.0, maxval=R_LSH,
                              dtype=jnp.float32)
    proj = (jnp.einsum('bne,er->bnr', Xs, alpha) + beta) / R_LSH
    proj = jnp.transpose(proj, (2, 0, 1))                 # [rounds, bs, N]
    x_pos = jnp.argsort(proj, axis=-1)                    # bucket ordering
    x_rev = jnp.argsort(x_pos, axis=-1)

    d = inner // heads

    def split_heads(t):
        return t.reshape(B, N, heads, d).transpose(0, 2, 1, 3).reshape(bs, N, d)

    qh, kh, vh = split_heads(q), split_heads(k), split_heads(v)

    idx = jnp.broadcast_to(x_pos[..., None], (N_ROUNDS, bs, N, d))

    # TODO(synk): move this bucket gather into the attention kernel via scalar
    # prefetch of x_pos + data-dependent index_maps (avoids three gathered
    # copies of q/k/v in HBM).
    def gather_rounds(t):
        tb = jnp.broadcast_to(t[None], (N_ROUNDS, bs, N, d))
        return jnp.take_along_axis(tb, idx, axis=2)

    sq = gather_rounds(qh).reshape(-1, ATTN, d)
    sk = gather_rounds(kh).reshape(-1, ATTN, d)
    sv = gather_rounds(vh).reshape(-1, ATTN, d)

    bo, lse = pallas_block_attention(sq, sk, sv)          # hot path in Pallas
    bo = bo.reshape(N_ROUNDS, bs, N, d)
    slog = lse.reshape(N_ROUNDS, bs, N)

    rev_idx = jnp.broadcast_to(x_rev[..., None], (N_ROUNDS, bs, N, d))
    o = jnp.take_along_axis(bo, rev_idx, axis=2)
    logits = jnp.take_along_axis(slog, x_rev, axis=2)
    probs = jax.nn.softmax(logits, axis=0)                # softmax over rounds
    out = jnp.sum(o.astype(jnp.float32) * probs[..., None], axis=0)   # [bs, N, d]

    out = out.reshape(B, heads, N, d).transpose(0, 2, 1, 3).reshape(B, N, inner)
    return pallas_matmul(out.reshape(-1, inner), p['to_out']).reshape(B, N, c)


def sahab_apply(p, x, mask, heads, shift, key):
    """x: [b,h,w,c] (NHWC).  mask is dead code on the non-sparse path."""
    b, h, w, c = x.shape
    if shift > 0:
        x = jnp.roll(x, (-shift, -shift), axis=(1, 2))
        # reference also rolls `mask`, which is unused when sparse=False
    nh, nw = h // WIN, w // WIN
    xw = x.reshape(b, nh, WIN, nw, WIN, c).transpose(0, 1, 3, 2, 4, 5)
    xs = xw.reshape(b * nh * nw, WIN * WIN, c)

    y = layernorm(xs, p['ln1_g'], p['ln1_b'])             # PreNorm
    y = sah_msa_apply(p['attn'], y, heads, key)
    xs = y + xs

    x = xs.reshape(b, nh, nw, WIN, WIN, c).transpose(0, 1, 3, 2, 4, 5)
    x = x.reshape(b, h, w, c)
    if shift > 0:
        x = jnp.roll(x, (shift, shift), axis=(1, 2))

    y = layernorm(x, p['ln2_g'], p['ln2_b'])              # PreNorm
    return ffn_apply(p['ffn'], y) + x


def sahabs_apply(p_list, x, mask, heads, key):
    """x: [b,h,w,c] NHWC, mask: [b,h,w,1] (unused on the non-sparse path)."""
    for i, bp in enumerate(p_list):
        key, sub = jax.random.split(key)
        shift = 0 if i % 2 == 0 else PATCH[0]
        x = sahab_apply(bp, x, mask, heads, shift, sub)
    return x


def aspp_apply(p, x, key):
    B, H, W, C = x.shape
    res = []
    for w3, rate in zip(p['convs'], p['rates']):
        res.append(conv3x3(x, w3, dilation=rate, act='relu', out_dtype=jnp.bfloat16))
    # AdaptiveAvgPool2d(1) + 1x1 conv: M = B degenerate GEMV -> plain XLA.
    g = jnp.mean(x, axis=(1, 2))                                   # (B, C)
    g = jnp.maximum(jnp.dot(g.astype(jnp.float32), p['pool_w']), 0.0)
    # bilinear upsample from 1x1 to HxW == broadcast
    res.append(jnp.broadcast_to(g[:, None, None, :].astype(jnp.bfloat16),
                                (B, H, W, g.shape[-1])))
    y = conv1x1(jnp.concatenate(res, axis=-1), p['proj_w'], act='relu')
    # nn.Dropout(0.5): reference module runs in training mode by default
    keep = jax.random.bernoulli(key, 0.5, y.shape)
    return jnp.where(keep, y * 2.0, 0.0)


def se_apply(p, x, key):
    """Sparsity_Estimator (sparse=False). x: [b,h,w,28] NHWC."""
    fea = conv1x1(x, p['in_proj'], act='lrelu')           # f32 (skip-carried)
    skips = []
    for lp in p['enc']:
        skips.append(fea)
        h1 = conv1x1(fea, lp['c1'], act='lrelu', out_dtype=jnp.bfloat16)
        h2 = pallas_depthwise3x3(h1, lp['dw'], stride=2, act='lrelu',
                                 out_dtype=jnp.bfloat16)
        fea = conv1x1(h2, lp['c3'])
    key, kd = jax.random.split(key)
    fea = aspp_apply(p['aspp'], fea, kd) + fea
    for i, lp in enumerate(p['dec']):
        fea = conv_transpose2x2_s2(fea, lp['up_w'], lp['up_b'])
        h1 = conv1x1(fea, lp['c1'], act='lrelu', out_dtype=jnp.bfloat16)
        h2 = pallas_depthwise3x3(h1, lp['dw'], stride=1, act='lrelu',
                                 out_dtype=jnp.bfloat16)
        fea = conv1x1(h2, lp['c3']) + skips[1 - i]
    return conv3x3(fea, p['out_w'], dilation=1)


def cst_apply(p, x_nchw, mask_nchw, key, dim=DIM, stage=STAGE):
    """CST forward.  x, mask: [b, 28, h, w] (NCHW); returns [b, 28, h, w]."""
    x = jnp.transpose(x_nchw, (0, 2, 3, 1)).astype(jnp.float32)
    m = jnp.transpose(mask_nchw, (0, 2, 3, 1)).astype(jnp.float32)
    b, h, w, _ = x.shape

    x = conv1x1(jnp.concatenate([x, m], axis=-1), p['fution'])

    key, k_fe, k_mask = jax.random.split(key, 3)
    fea = se_apply(p['fe'], x, k_fe)
    # non-sparse branch: mask = torch.randn((b,1,h,w)) in the reference
    mask = jax.random.normal(k_mask, (b, h, w, 1), jnp.float32)

    skips, masks = [], []
    ds = dim
    for lp in p['enc']:
        key, sub = jax.random.split(key)
        fea = sahabs_apply(lp['block'], fea, mask, heads=ds // dim, key=sub)
        masks.append(mask)
        skips.append(fea)
        fea = conv4x4_s2(fea, lp['down_w'])
        mask = avgpool2(mask)
        ds *= 2

    key, sub = jax.random.split(key)
    fea = sahabs_apply(p['bottleneck'], fea, mask, heads=ds // dim, key=sub)

    for i, lp in enumerate(p['dec']):
        fea = conv_transpose2x2_s2(fea, lp['up_w'], lp['up_b'])
        fea = fea + skips[stage - 1 - i]
        mask = masks[stage - 1 - i]
        ds //= 2
        key, sub = jax.random.split(key)
        fea = sahabs_apply(lp['block'], fea, mask, heads=ds // dim, key=sub)

    out = conv3x3(fea, p['out_proj'], dilation=1) + x
    return jnp.transpose(out, (0, 3, 1, 2))


# ----------------------------------------------------------------------------
# main
# ----------------------------------------------------------------------------
if __name__ == "__main__":
    # Smallest spatial size compatible with the architecture: the 16x16 SAHAB
    # windows must tile the feature map after two 2x downsamples => H, W = 64.
    b, c, h, w = 1, 28, 64, 64
    key = jax.random.PRNGKey(0)
    k_x, k_m, k_fwd = jax.random.split(key, 3)
    x = jax.random.normal(k_x, (b, c, h, w), jnp.float32)
    mask = jax.random.normal(k_m, (b, c, h, w), jnp.float32)

    params = init_cst()
    out = cst_apply(params, x, mask, k_fwd)
    out = jax.block_until_ready(out)
    assert out.shape == (b, c, h, w), out.shape
    assert bool(jnp.all(jnp.isfinite(out)))
    print("KERNEL_OK")
</pallas_src>

<mosaic_0001>
module attributes {stable_mosaic.version = 11 : i64} {
  func.func @_mm_kernel(%arg0: i32, %arg1: memref<1024x56xbf16, #tpu.memory_space<vmem>>, %arg2: memref<56x28xbf16, #tpu.memory_space<vmem>>, %arg3: memref<1024x28xf32, #tpu.memory_space<vmem>>) attributes {dimension_semantics = [#tpu.dimension_semantics<parallel>], iteration_bounds = array<i64: 4>, scalar_prefetch = 0 : i64, scratch_operands = 0 : i64, tpu.core_type = #tpu.core_type<tc>, window_params = [{transform_indices = @transform_0, window_bounds = array<i64: 1024, 56>}, {pipeline_mode = #tpu.pipeline_mode<synchronous>, transform_indices = @transform_1, window_bounds = array<i64: 56, 28>}, {transform_indices = @transform_2, window_bounds = array<i64: 1024, 28>}]} {
    %c0 = arith.constant 0 : index
    %c0_0 = arith.constant 0 : index
    %0 = vector.load %arg1[%c0, %c0_0] : memref<1024x56xbf16, #tpu.memory_space<vmem>>, vector<1024x56xbf16>
    %c0_1 = arith.constant 0 : index
    %c0_2 = arith.constant 0 : index
    %1 = vector.load %arg2[%c0_1, %c0_2] : memref<56x28xbf16, #tpu.memory_space<vmem>>, vector<56x28xbf16>
    %cst = arith.constant dense<0.000000e+00> : vector<1024x28xf32>
    %2 = tpu.matmul %0, %1, %cst {dimension_numbers = #tpu.dot_dimension_numbers<[1], [0], [0], [1], [0, 0, 1, 1], [], []>} : vector<1024x56xbf16>, vector<56x28xbf16>, vector<1024x28xf32> -> vector<1024x28xf32>
    %c0_3 = arith.constant 0 : index
    %c0_4 = arith.constant 0 : index
    %3 = vector.load %arg3[%c0_3, %c0_4] : memref<1024x28xf32, #tpu.memory_space<vmem>>, vector<1024x28xf32>
    tpu.vector_store %arg3[%c0_3, %c0_4], %2 {strides = array<i32>} : memref<1024x28xf32, #tpu.memory_space<vmem>>, vector<1024x28xf32>,
    return
  }
  func.func @transform_0(%arg0: i32) -> (i32, i32) {
    %c0_i32 = arith.constant 0 : i32
    %c0_i32_0 = arith.constant 0 : i32
    return %arg0, %c0_i32 : i32, i32
  }
  func.func @transform_1(%arg0: i32) -> (i32, i32) {
    %c0_i32 = arith.constant 0 : i32
    %c0_i32_0 = arith.constant 0 : i32
    %c0_i32_1 = arith.constant 0 : i32
    return %c0_i32, %c0_i32_0 : i32, i32
  }
  func.func @transform_2(%arg0: i32) -> (i32, i32) {
    %c0_i32 = arith.constant 0 : i32
    %c0_i32_0 = arith.constant 0 : i32
    return %arg0, %c0_i32 : i32, i32
  }
}

</mosaic_0001>

<bundles_post_ra>
// kernel: tpu_custom_call.1
= control target key start
LH: loop header
LB: loop body
LE: loop exit
PB: predicated region body
PF: predicated region fallthrough
CT: control target
= control target key end

     0   :  { %s1788_s9 = smov 0   ;;  %s2209_s0 = inlined_call_operand.vmem [shape: bf16[4096,56], index: 0, kind: input, shape index: {}]   ;;  %s2210_s1 = inlined_call_operand.vmem [shape: bf16[56,28], index: 1, kind: input, shape index: {}]   ;;  %s2211_s2 = inlined_call_operand.vmem [shape: f32[4096,28], index: 2, kind: output, shape index: {}]  }
   0x1 LB: > { %s1335_s10 = sadd.s32 4294967295, %s1771_s9   ;;  %p1339_p0 = scmp.ge.s32.totalorder %s1771_s9, 1  ;;  %s1771_s9 = sphi %s1788_s9, %s12_s9  }
   0x2   : > { %p113_p1 = scmp.lt.s32.totalorder %s1771_s9, 5 }
   0x4   : > { %p114_p2 = pnand %p1339_p0, %p113_p1 }
   0x5   : > { %s1340_s13 = sshll.u32 (!%p114_p2), %s1335_s10, 7 }
   0x6   : > { %117 = sbr.rel (%p114_p2) target bundleno = 415 (0x19f), region = 28  ;;  %p136_p3 = scmp.lt.s32.totalorder (!%p114_p2), %s1340_s13, 511 }
   0xb   : > { %v282_v0 = vld [vmem:[%s2210_s1 + $0x18] sm:$0xf]  ;;  %vm817_vm0 = vcmask 1043456   ;;  %v1744_v4 = vld [vmem:[%s2210_s1 + $0x10] sm:$0xff]  ;;  %s2213_s13 = smov (!%p136_p3, %s1340_s13), 511  ;;  %v1743_v5 = vld [vmem:[%s2210_s1 + $0x8] sm:$0xff] }
   0xc   : > { %v616_v1 = vunpack.c.l.b16 %v282_v0  ;;  %s1341_s18 = sshll.u32 %s2213_s13, 2  ;;  %v1742_v6 = vld [vmem:[%s2210_s1] sm:$0xff]  ;;  %vm624_vm1 = vcmask 457728   ;;  %s1343_s24 = sshll.u32 %s2213_s13, 3  ;;  %vm1150_vm2 = vcmask 228352  }
   0xd   : > { %s1814_s23 = scalar_lea.vmem %s2209_s0, %s1341_s18  ;;  %s1884_s27 = scalar_lea.vmem %s2211_s2, %s1343_s24 }
   0xe   : > { %v620_v2 = vpack.c.b16 %v616_v1, %v616_v1  ;;  %v1678_v7 = vld [vmem:[%s1814_s23] sm:$0xff]  ;;  %v1679_v11 = vld [vmem:[%s1814_s23 + $0x8] sm:$0xff]  ;;  %v1680_v15 = vld [vmem:[%s1814_s23 + $0x10] sm:$0xff] }
   0xf   : > { %v1694_v8 = vld [vmem:[%s1814_s23 + $0x80] sm:$0xff]  ;;  %v1695_v12 = vld [vmem:[%s1814_s23 + $0x88] sm:$0xff]  ;;  %v1696_v16 = vld [vmem:[%s1814_s23 + $0x90] sm:$0xff] }
  0x10   : > { %v819_v3 = vsel %vm817_vm0, %v620_v2, 0  ;;  %v1710_v9 = vld [vmem:[%s1814_s23 + $0x100] sm:$0xff]  ;;  %v1711_v13 = vld [vmem:[%s1814_s23 + $0x108] sm:$0xff]  ;;  %v1712_v17 = vld [vmem:[%s1814_s23 + $0x110] sm:$0xff] }
  0x11   : > { %825 = vmatpush.bf16.msra.mxu0 %v819_v3  ;;  %1745 = vmatpush.bf16.msra.mxu1 %v819_v3  ;;  %v1726_v10 = vld [vmem:[%s1814_s23 + $0x180] sm:$0xff]  ;;  %v1727_v14 = vld [vmem:[%s1814_s23 + $0x188] sm:$0xff]  ;;  %v1728_v18 = vld [vmem:[%s1814_s23 + $0x190] sm:$0xff] }
  0x12   : > { %1746 = vmatpush.bf16.msra.mxu2 %v819_v3  ;;  %1747 = vmatpush.bf16.msra.mxu3 %v819_v3  ;;  %v1681_v19 = vld [vmem:[%s1814_s23 + $0x18] sm:$0xff]  ;;  %v1682_v23 = vld [vmem:[%s1814_s23 + $0x20] sm:$0xff]  ;;  %v1683_v27 = vld [vmem:[%s1814_s23 + $0x28] sm:$0xff] }
  0x13   : > { %v1697_v20 = vld [vmem:[%s1814_s23 + $0x98] sm:$0xff]  ;;  %v1698_v24 = vld [vmem:[%s1814_s23 + $0xa0] sm:$0xff]  ;;  %v1699_v28 = vld [vmem:[%s1814_s23 + $0xa8] sm:$0xff] }
  0x14   : > { %v1713_v21 = vld [vmem:[%s1814_s23 + $0x118] sm:$0xff]  ;;  %v1714_v25 = vld [vmem:[%s1814_s23 + $0x120] sm:$0xff]  ;;  %v1715_v29 = vld [vmem:[%s1814_s23 + $0x128] sm:$0xff] }
  0x15   : > { %826 = vmatpush.bf16.msra.mxu0 %v1744_v4  ;;  %1748 = vmatpush.bf16.msra.mxu1 %v1744_v4  ;;  %v1729_v22 = vld [vmem:[%s1814_s23 + $0x198] sm:$0xff]  ;;  %v1730_v26 = vld [vmem:[%s1814_s23 + $0x1a0] sm:$0xff]  ;;  %v1731_v30 = vld [vmem:[%s1814_s23 + $0x1a8] sm:$0xff] }
  0x16   : > { %1749 = vmatpush.bf16.msra.mxu2 %v1744_v4  ;;  %1750 = vmatpush.bf16.msra.mxu3 %v1744_v4  ;;  %v1684_v31 = vld [vmem:[%s1814_s23 + $0x30] sm:$0xff]  ;;  %v1685_v35 = vld [vmem:[%s1814_s23 + $0x38] sm:$0xff]  ;;  %v1686_v39 = vld [vmem:[%s1814_s23 + $0x40] sm:$0xff] }
  0x17   : > { %v1700_v32 = vld [vmem:[%s1814_s23 + $0xb0] sm:$0xff]  ;;  %v1701_v36 = vld [vmem:[%s1814_s23 + $0xb8] sm:$0xff]  ;;  %v1702_v40 = vld [vmem:[%s1814_s23 + $0xc0] sm:$0xff] }
  0x18   : > { %v1716_v33 = vld [vmem:[%s1814_s23 + $0x130] sm:$0xff]  ;;  %v1717_v37 = vld [vmem:[%s1814_s23 + $0x138] sm:$0xff]  ;;  %v1718_v43 = vld [vmem:[%s1814_s23 + $0x140] sm:$0xff] }
  0x19   : > { %827 = vmatpush.bf16.msra.mxu0 %v1743_v5  ;;  %1751 = vmatpush.bf16.msra.mxu1 %v1743_v5  ;;  %v1732_v34 = vld [vmem:[%s1814_s23 + $0x1b0] sm:$0xff]  ;;  %v1733_v38 = vld [vmem:[%s1814_s23 + $0x1b8] sm:$0xff]  ;;  %v1734_v44 = vld [vmem:[%s1814_s23 + $0x1c0] sm:$0xff] }
  0x1a   : > { %1752 = vmatpush.bf16.msra.mxu2 %v1743_v5  ;;  %1753 = vmatpush.bf16.msra.mxu3 %v1743_v5  ;;  %v1687_v51 = vld [vmem:[%s1814_s23 + $0x48] sm:$0xff]  ;;  %v1688_v63 = vld [vmem:[%s1814_s23 + $0x50] sm:$0xff] }
  0x1b   : > { %v1703_v52 = vld [vmem:[%s1814_s23 + $0xc8] sm:$0xff]  ;;  %v1704_v0 = vld [vmem:[%s1814_s23 + $0xd0] sm:$0xff] }
  0x1c   : > { %v1719_v55 = vld [vmem:[%s1814_s23 + $0x148] sm:$0xff]  ;;  %v1720_v3 = vld [vmem:[%s1814_s23 + $0x150] sm:$0xff] }
  0x1d   : > { %828 = vmatpush.bf16.msra.mxu0 %v1742_v6  ;;  %1754 = vmatpush.bf16.msra.mxu1 %v1742_v6  ;;  %v1735_v56 = vld [vmem:[%s1814_s23 + $0x1c8] sm:$0xff]  ;;  %v1736_v4 = vld [vmem:[%s1814_s23 + $0x1d0] sm:$0xff] }
  0x1e   : > { %1755 = vmatpush.bf16.msra.mxu2 %v1742_v6  ;;  %1756 = vmatpush.bf16.msra.mxu3 %v1742_v6 }
  0x20   : > { %1612 = vmatmul.msk.bf16.vlgmr.msra.gmra.mxu0 %vm624_vm1, %v1678_v7  ;;  %1628 = vmatmul.msk.bf16.vlgmr.msra.gmra.mxu1 %vm624_vm1, %v1694_v8 }
  0x21   : > { %1644 = vmatmul.msk.bf16.vlgmr.msra.gmra.mxu2 %vm624_vm1, %v1710_v9  ;;  %1660 = vmatmul.msk.bf16.vlgmr.msra.gmra.mxu3 %vm624_vm1, %v1726_v10 }
  0x30   : > { %1613 = vmatmul.msk.bf16.gmra.mxu0 %vm624_vm1, %v1679_v11  ;;  %1629 = vmatmul.msk.bf16.gmra.mxu1 %vm624_vm1, %v1695_v12  ;;  %v1689_v11 = vld [vmem:[%s1814_s23 + $0x58] sm:$0xff] }
  0x31   : > { %1645 = vmatmul.msk.bf16.gmra.mxu2 %vm624_vm1, %v1711_v13  ;;  %1661 = vmatmul.msk.bf16.gmra.mxu3 %vm624_vm1, %v1727_v14  ;;  %v1705_v12 = vld [vmem:[%s1814_s23 + $0xd8] sm:$0xff] }
  0x40   : > { %1614 = vmatmul.msk.bf16.gmra.mxu0 %vm624_vm1, %v1680_v15  ;;  %1630 = vmatmul.msk.bf16.gmra.mxu1 %vm624_vm1, %v1696_v16  ;;  %v1721_v15 = vld [vmem:[%s1814_s23 + $0x158] sm:$0xff] }
  0x41   : > { %1646 = vmatmul.msk.bf16.gmra.mxu2 %vm624_vm1, %v1712_v17  ;;  %1662 = vmatmul.msk.bf16.gmra.mxu3 %vm624_vm1, %v1728_v18  ;;  %v1737_v16 = vld [vmem:[%s1814_s23 + $0x1d8] sm:$0xff] }
  0x50   : > { %1615 = vmatmul.msk.bf16.gmra.mxu0 %vm624_vm1, %v1681_v19  ;;  %1631 = vmatmul.msk.bf16.gmra.mxu1 %vm624_vm1, %v1697_v20 }
  0x51   : > { %1647 = vmatmul.msk.bf16.gmra.mxu2 %vm624_vm1, %v1713_v21  ;;  %1663 = vmatmul.msk.bf16.gmra.mxu3 %vm624_vm1, %v1729_v22 }
  0x60   : > { %1616 = vmatmul.msk.bf16.gmra.mxu0 %vm624_vm1, %v1682_v23  ;;  %1632 = vmatmul.msk.bf16.gmra.mxu1 %vm624_vm1, %v1698_v24  ;;  %v1690_v23 = vld [vmem:[%s1814_s23 + $0x60] sm:$0xff] }
  0x61   : > { %1648 = vmatmul.msk.bf16.gmra.mxu2 %vm624_vm1, %v1714_v25  ;;  %1664 = vmatmul.msk.bf16.gmra.mxu3 %vm624_vm1, %v1730_v26  ;;  %v1706_v24 = vld [vmem:[%s1814_s23 + $0xe0] sm:$0xff] }
  0x70   : > { %1617 = vmatmul.msk.bf16.gmra.mxu0 %vm624_vm1, %v1683_v27  ;;  %1633 = vmatmul.msk.bf16.gmra.mxu1 %vm624_vm1, %v1699_v28  ;;  %v1722_v27 = vld [vmem:[%s1814_s23 + $0x160] sm:$0xff] }
  0x71   : > { %1649 = vmatmul.msk.bf16.gmra.mxu2 %vm624_vm1, %v1715_v29  ;;  %1665 = vmatmul.msk.bf16.gmra.mxu3 %vm624_vm1, %v1731_v30  ;;  %v1738_v28 = vld [vmem:[%s1814_s23 + $0x1e0] sm:$0xff] }
  0x80   : > { %1618 = vmatmul.msk.bf16.gmra.mxu0 %vm624_vm1, %v1684_v31  ;;  %1634 = vmatmul.msk.bf16.gmra.mxu1 %vm624_vm1, %v1700_v32 }
  0x81   : > { %1650 = vmatmul.msk.bf16.gmra.mxu2 %vm624_vm1, %v1716_v33  ;;  %1666 = vmatmul.msk.bf16.gmra.mxu3 %vm624_vm1, %v1732_v34 }
  0x90   : > { %1619 = vmatmul.msk.bf16.gmra.mxu0 %vm624_vm1, %v1685_v35  ;;  %1635 = vmatmul.msk.bf16.gmra.mxu1 %vm624_vm1, %v1701_v36  ;;  %v1691_v35 = vld [vmem:[%s1814_s23 + $0x68] sm:$0xff] }
  0x91   : > { %1651 = vmatmul.msk.bf16.gmra.mxu2 %vm624_vm1, %v1717_v37  ;;  %1667 = vmatmul.msk.bf16.gmra.mxu3 %vm624_vm1, %v1733_v38  ;;  %v1707_v36 = vld [vmem:[%s1814_s23 + $0xe8] sm:$0xff] }
  0x9d   : > { %v830_v41 = vpop.f32.mrf.mxu0  ;;  %v910_v42 = vpop.f32.mrf.mxu1 }
  0x9e   : > { %1151 = vst.msk [vmem:[%s1884_s27] sm:$0xff] %vm1150_vm2, %v830_v41 }
  0x9f   : > { %1183 = vst.msk [vmem:[%s1884_s27 + $0x100] sm:$0xff] %vm1150_vm2, %v910_v42 }
  0xa0   : > { %1620 = vmatmul.msk.bf16.gmra.mxu0 %vm624_vm1, %v1686_v39  ;;  %1636 = vmatmul.msk.bf16.gmra.mxu1 %vm624_vm1, %v1702_v40  ;;  %v1723_v39 = vld [vmem:[%s1814_s23 + $0x168] sm:$0xff] }
  0xa1   : > { %1652 = vmatmul.msk.bf16.gmra.mxu2 %vm624_vm1, %v1718_v43  ;;  %1668 = vmatmul.msk.bf16.gmra.mxu3 %vm624_vm1, %v1734_v44  ;;  %v1739_v40 = vld [vmem:[%s1814_s23 + $0x1e8] sm:$0xff] }
  0xa4   : > { %v990_v45 = vpop.f32.mrf.mxu2  ;;  %v1070_v46 = vpop.f32.mrf.mxu3 }
  0xa5   : > { %1215 = vst.msk [vmem:[%s1884_s27 + $0x200] sm:$0xff] %vm1150_vm2, %v990_v45  ;;  %v832_v47 = vpop.f32.mrf.mxu0  ;;  %v912_v48 = vpop.f32.mrf.mxu1 }
  0xa6   : > { %1247 = vst.msk [vmem:[%s1884_s27 + $0x300] sm:$0xff] %vm1150_vm2, %v1070_v46 }
  0xa7   : > { %1152 = vst.msk [vmem:[%s1884_s27 + $0x8] sm:$0xff] %vm1150_vm2, %v832_v47  ;;  %v1692_v47 = vld [vmem:[%s1814_s23 + $0x70] sm:$0xff] }
  0xa8   : > { %1184 = vst.msk [vmem:[%s1884_s27 + $0x108] sm:$0xff] %vm1150_vm2, %v912_v48  ;;  %v1708_v48 = vld [vmem:[%s1814_s23 + $0xf0] sm:$0xff] }
  0xac   : > { %v992_v49 = vpop.f32.mrf.mxu2  ;;  %v1072_v50 = vpop.f32.mrf.mxu3 }
  0xad   : > { %1216 = vst.msk [vmem:[%s1884_s27 + $0x208] sm:$0xff] %vm1150_vm2, %v992_v49  ;;  %v835_v53 = vpop.f32.mrf.mxu0  ;;  %v915_v54 = vpop.f32.mrf.mxu1 }
  0xae   : > { %1248 = vst.msk [vmem:[%s1884_s27 + $0x308] sm:$0xff] %vm1150_vm2, %v1072_v50 }
  0xaf   : > { %1153 = vst.msk [vmem:[%s1884_s27 + $0x10] sm:$0xff] %vm1150_vm2, %v835_v53 }
  0xb0   : > { %1185 = vst.msk [vmem:[%s1884_s27 + $0x110] sm:$0xff] %vm1150_vm2, %v915_v54  ;;  %1621 = vmatmul.msk.bf16.gmra.mxu0 %vm624_vm1, %v1687_v51  ;;  %1637 = vmatmul.msk.bf16.gmra.mxu1 %vm624_vm1, %v1703_v52  ;;  %v1724_v51 = vld [vmem:[%s1814_s23 + $0x170] sm:$0xff] }
  0xb1   : > { %1653 = vmatmul.msk.bf16.gmra.mxu2 %vm624_vm1, %v1719_v55  ;;  %1669 = vmatmul.msk.bf16.gmra.mxu3 %vm624_vm1, %v1735_v56  ;;  %v1740_v52 = vld [vmem:[%s1814_s23 + $0x1f0] sm:$0xff] }
  0xb4   : > { %v995_v57 = vpop.f32.mrf.mxu2  ;;  %v1075_v58 = vpop.f32.mrf.mxu3 }
  0xb5   : > { %1217 = vst.msk [vmem:[%s1884_s27 + $0x210] sm:$0xff] %vm1150_vm2, %v995_v57  ;;  %v837_v59 = vpop.f32.mrf.mxu0  ;;  %v917_v60 = vpop.f32.mrf.mxu1 }
  0xb6   : > { %1249 = vst.msk [vmem:[%s1884_s27 + $0x310] sm:$0xff] %vm1150_vm2, %v1075_v58 }
  0xb7   : > { %1154 = vst.msk [vmem:[%s1884_s27 + $0x18] sm:$0xff] %vm1150_vm2, %v837_v59  ;;  %v1693_v59 = vld [vmem:[%s1814_s23 + $0x78] sm:$0xff] }
  0xb8   : > { %1186 = vst.msk [vmem:[%s1884_s27 + $0x118] sm:$0xff] %vm1150_vm2, %v917_v60  ;;  %v1709_v60 = vld [vmem:[%s1814_s23 + $0xf8] sm:$0xff] }
  0xbc   : > { %v997_v61 = vpop.f32.mrf.mxu2  ;;  %v1077_v62 = vpop.f32.mrf.mxu3 }
  0xbd   : > { %1218 = vst.msk [vmem:[%s1884_s27 + $0x218] sm:$0xff] %vm1150_vm2, %v997_v61  ;;  %v840_v1 = vpop.f32.mrf.mxu0  ;;  %v920_v2 = vpop.f32.mrf.mxu1 }
  0xbe   : > { %1250 = vst.msk [vmem:[%s1884_s27 + $0x318] sm:$0xff] %vm1150_vm2, %v1077_v62 }
  0xbf   : > { %1155 = vst.msk [vmem:[%s1884_s27 + $0x20] sm:$0xff] %vm1150_vm2, %v840_v1 }
  0xc0   : > { %1187 = vst.msk [vmem:[%s1884_s27 + $0x120] sm:$0xff] %vm1150_vm2, %v920_v2  ;;  %1622 = vmatmul.msk.bf16.gmra.mxu0 %vm624_vm1, %v1688_v63  ;;  %1638 = vmatmul.msk.bf16.gmra.mxu1 %vm624_vm1, %v1704_v0  ;;  %v1725_v63 = vld [vmem:[%s1814_s23 + $0x178] sm:$0xff] }
  0xc1   : > { %1654 = vmatmul.msk.bf16.gmra.mxu2 %vm624_vm1, %v1720_v3  ;;  %1670 = vmatmul.msk.bf16.gmra.mxu3 %vm624_vm1, %v1736_v4  ;;  %v1741_v0 = vld [vmem:[%s1814_s23 + $0x1f8] sm:$0xff] }
  0xc4   : > { %v1000_v5 = vpop.f32.mrf.mxu2  ;;  %v1080_v6 = vpop.f32.mrf.mxu3 }
  0xc5   : > { %1219 = vst.msk [vmem:[%s1884_s27 + $0x220] sm:$0xff] %vm1150_vm2, %v1000_v5  ;;  %v842_v7 = vpop.f32.mrf.mxu0  ;;  %v922_v8 = vpop.f32.mrf.mxu1 }
  0xc6   : > { %1251 = vst.msk [vmem:[%s1884_s27 + $0x320] sm:$0xff] %vm1150_vm2, %v1080_v6 }
  0xc7   : > { %1156 = vst.msk [vmem:[%s1884_s27 + $0x28] sm:$0xff] %vm1150_vm2, %v842_v7 }
  0xc8   : > { %1188 = vst.msk [vmem:[%s1884_s27 + $0x128] sm:$0xff] %vm1150_vm2, %v922_v8 }
  0xcc   : > { %v1002_v9 = vpop.f32.mrf.mxu2  ;;  %v1082_v10 = vpop.f32.mrf.mxu3 }
  0xcd   : > { %1220 = vst.msk [vmem:[%s1884_s27 + $0x228] sm:$0xff] %vm1150_vm2, %v1002_v9  ;;  %v845_v13 = vpop.f32.mrf.mxu0  ;;  %v925_v14 = vpop.f32.mrf.mxu1 }
  0xce   : > { %1252 = vst.msk [vmem:[%s1884_s27 + $0x328] sm:$0xff] %vm1150_vm2, %v1082_v10 }
  0xcf   : > { %1157 = vst.msk [vmem:[%s1884_s27 + $0x30] sm:$0xff] %vm1150_vm2, %v845_v13 }
  0xd0   : > { %1189 = vst.msk [vmem:[%s1884_s27 + $0x130] sm:$0xff] %vm1150_vm2, %v925_v14  ;;  %1623 = vmatmul.msk.bf16.gmra.mxu0 %vm624_vm1, %v1689_v11  ;;  %1639 = vmatmul.msk.bf16.gmra.mxu1 %vm624_vm1, %v1705_v12 }
  0xd1   : > { %1655 = vmatmul.msk.bf16.gmra.mxu2 %vm624_vm1, %v1721_v15  ;;  %1671 = vmatmul.msk.bf16.gmra.mxu3 %vm624_vm1, %v1737_v16 }
  0xd4   : > { %v1005_v17 = vpop.f32.mrf.mxu2  ;;  %v1085_v18 = vpop.f32.mrf.mxu3 }
  0xd5   : > { %1221 = vst.msk [vmem:[%s1884_s27 + $0x230] sm:$0xff] %vm1150_vm2, %v1005_v17  ;;  %v847_v19 = vpop.f32.mrf.mxu0  ;;  %v927_v20 = vpop.f32.mrf.mxu1 }
  0xd6   : > { %1253 = vst.msk [vmem:[%s1884_s27 + $0x330] sm:$0xff] %vm1150_vm2, %v1085_v18 }
  0xd7   : > { %1158 = vst.msk [vmem:[%s1884_s27 + $0x38] sm:$0xff] %vm1150_vm2, %v847_v19 }
  0xd8   : > { %1190 = vst.msk [vmem:[%s1884_s27 + $0x138] sm:$0xff] %vm1150_vm2, %v927_v20 }
  0xdc   : > { %v1007_v21 = vpop.f32.mrf.mxu2  ;;  %v1087_v22 = vpop.f32.mrf.mxu3 }
  0xdd   : > { %1222 = vst.msk [vmem:[%s1884_s27 + $0x238] sm:$0xff] %vm1150_vm2, %v1007_v21  ;;  %v850_v25 = vpop.f32.mrf.mxu0  ;;  %v930_v26 = vpop.f32.mrf.mxu1 }
  0xde   : > { %1254 = vst.msk [vmem:[%s1884_s27 + $0x338] sm:$0xff] %vm1150_vm2, %v1087_v22 }
  0xdf   : > { %1159 = vst.msk [vmem:[%s1884_s27 + $0x40] sm:$0xff] %vm1150_vm2, %v850_v25 }
  0xe0   : > { %1191 = vst.msk [vmem:[%s1884_s27 + $0x140] sm:$0xff] %vm1150_vm2, %v930_v26  ;;  %1624 = vmatmul.msk.bf16.gmra.mxu0 %vm624_vm1, %v1690_v23  ;;  %1640 = vmatmul.msk.bf16.gmra.mxu1 %vm624_vm1, %v1706_v24 }
  0xe1   : > { %1656 = vmatmul.msk.bf16.gmra.mxu2 %vm624_vm1, %v1722_v27  ;;  %1672 = vmatmul.msk.bf16.gmra.mxu3 %vm624_vm1, %v1738_v28 }
  0xe4   : > { %v1010_v29 = vpop.f32.mrf.mxu2  ;;  %v1090_v30 = vpop.f32.mrf.mxu3 }
  0xe5   : > { %1223 = vst.msk [vmem:[%s1884_s27 + $0x240] sm:$0xff] %vm1150_vm2, %v1010_v29  ;;  %v852_v31 = vpop.f32.mrf.mxu0  ;;  %v932_v32 = vpop.f32.mrf.mxu1 }
  0xe6   : > { %1255 = vst.msk [vmem:[%s1884_s27 + $0x340] sm:$0xff] %vm1150_vm2, %v1090_v30 }
  0xe7   : > { %1160 = vst.msk [vmem:[%s1884_s27 + $0x48] sm:$0xff] %vm1150_vm2, %v852_v31 }
  0xe8   : > { %1192 = vst.msk [vmem:[%s1884_s27 + $0x148] sm:$0xff] %vm1150_vm2, %v932_v32 }
  0xec   : > { %v1012_v33 = vpop.f32.mrf.mxu2  ;;  %v1092_v34 = vpop.f32.mrf.mxu3 }
  0xed   : > { %1224 = vst.msk [vmem:[%s1884_s27 + $0x248] sm:$0xff] %vm1150_vm2, %v1012_v33  ;;  %v855_v37 = vpop.f32.mrf.mxu0  ;;  %v935_v38 = vpop.f32.mrf.mxu1 }
  0xee   : > { %1256 = vst.msk [vmem:[%s1884_s27 + $0x348] sm:$0xff] %vm1150_vm2, %v1092_v34 }
  0xef   : > { %1161 = vst.msk [vmem:[%s1884_s27 + $0x50] sm:$0xff] %vm1150_vm2, %v855_v37 }
  0xf0   : > { %1193 = vst.msk [vmem:[%s1884_s27 + $0x150] sm:$0xff] %vm1150_vm2, %v935_v38  ;;  %1625 = vmatmul.msk.bf16.gmra.mxu0 %vm624_vm1, %v1691_v35  ;;  %1641 = vmatmul.msk.bf16.gmra.mxu1 %vm624_vm1, %v1707_v36 }
  0xf1   : > { %1657 = vmatmul.msk.bf16.gmra.mxu2 %vm624_vm1, %v1723_v39  ;;  %1673 = vmatmul.msk.bf16.gmra.mxu3 %vm624_vm1, %v1739_v40 }
  0xf4   : > { %v1015_v41 = vpop.f32.mrf.mxu2  ;;  %v1095_v42 = vpop.f32.mrf.mxu3 }
  0xf5   : > { %1225 = vst.msk [vmem:[%s1884_s27 + $0x250] sm:$0xff] %vm1150_vm2, %v1015_v41  ;;  %v857_v43 = vpop.f32.mrf.mxu0  ;;  %v937_v44 = vpop.f32.mrf.mxu1 }
  0xf6   : > { %1257 = vst.msk [vmem:[%s1884_s27 + $0x350] sm:$0xff] %vm1150_vm2, %v1095_v42 }
  0xf7   : > { %1162 = vst.msk [vmem:[%s1884_s27 + $0x58] sm:$0xff] %vm1150_vm2, %v857_v43 }
  0xf8   : > { %1194 = vst.msk [vmem:[%s1884_s27 + $0x158] sm:$0xff] %vm1150_vm2, %v937_v44 }
  0xfc   : > { %v1017_v45 = vpop.f32.mrf.mxu2  ;;  %v1097_v46 = vpop.f32.mrf.mxu3 }
  0xfd   : > { %1226 = vst.msk [vmem:[%s1884_s27 + $0x258] sm:$0xff] %vm1150_vm2, %v1017_v45  ;;  %v860_v49 = vpop.f32.mrf.mxu0  ;;  %v940_v50 = vpop.f32.mrf.mxu1 }
  0xfe   : > { %1258 = vst.msk [vmem:[%s1884_s27 + $0x358] sm:$0xff] %vm1150_vm2, %v1097_v46 }
  0xff   : > { %1163 = vst.msk [vmem:[%s1884_s27 + $0x60] sm:$0xff] %vm1150_vm2, %v860_v49 }
 0x100   : > { %1195 = vst.msk [vmem:[%s1884_s27 + $0x160] sm:$0xff] %vm1150_vm2, %v940_v50  ;;  %1626 = vmatmul.msk.bf16.gmra.mxu0 %vm624_vm1, %v1692_v47  ;;  %1642 = vmatmul.msk.bf16.gmra.mxu1 %vm624_vm1, %v1708_v48 }
 0x101   : > { %1658 = vmatmul.msk.bf16.gmra.mxu2 %vm624_vm1, %v1724_v51  ;;  %1674 = vmatmul.msk.bf16.gmra.mxu3 %vm624_vm1, %v1740_v52 }
 0x104   : > { %v1020_v53 = vpop.f32.mrf.mxu2  ;;  %v1100_v54 = vpop.f32.mrf.mxu3 }
 0x105   : > { %1227 = vst.msk [vmem:[%s1884_s27 + $0x260] sm:$0xff] %vm1150_vm2, %v1020_v53  ;;  %v862_v55 = vpop.f32.mrf.mxu0  ;;  %v942_v56 = vpop.f32.mrf.mxu1 }
 0x106   : > { %1259 = vst.msk [vmem:[%s1884_s27 + $0x360] sm:$0xff] %vm1150_vm2, %v1100_v54 }
 0x107   : > { %1164 = vst.msk [vmem:[%s1884_s27 + $0x68] sm:$0xff] %vm1150_vm2, %v862_v55 }
 0x108   : > { %1196 = vst.msk [vmem:[%s1884_s27 + $0x168] sm:$0xff] %vm1150_vm2, %v942_v56 }
 0x10c   : > { %v1022_v57 = vpop.f32.mrf.mxu2  ;;  %v1102_v58 = vpop.f32.mrf.mxu3 }
 0x10d   : > { %1228 = vst.msk [vmem:[%s1884_s27 + $0x268] sm:$0xff] %vm1150_vm2, %v1022_v57  ;;  %v865_v61 = vpop.f32.mrf.mxu0  ;;  %v945_v62 = vpop.f32.mrf.mxu1 }
 0x10e   : > { %1260 = vst.msk [vmem:[%s1884_s27 + $0x368] sm:$0xff] %vm1150_vm2, %v1102_v58 }
 0x10f   : > { %1165 = vst.msk [vmem:[%s1884_s27 + $0x70] sm:$0xff] %vm1150_vm2, %v865_v61 }
 0x110   : > { %1197 = vst.msk [vmem:[%s1884_s27 + $0x170] sm:$0xff] %vm1150_vm2, %v945_v62  ;;  %1627 = vmatmul.msk.bf16.gmra.mxu0 %vm624_vm1, %v1693_v59  ;;  %1643 = vmatmul.msk.bf16.gmra.mxu1 %vm624_vm1, %v1709_v60 }
 0x111   : > { %1659 = vmatmul.msk.bf16.gmra.mxu2 %vm624_vm1, %v1725_v63  ;;  %1675 = vmatmul.msk.bf16.gmra.mxu3 %vm624_vm1, %v1741_v0 }
 0x114   : > { %v1025_v1 = vpop.f32.mrf.mxu2  ;;  %v1105_v2 = vpop.f32.mrf.mxu3 }
 0x115   : > { %1229 = vst.msk [vmem:[%s1884_s27 + $0x270] sm:$0xff] %vm1150_vm2, %v1025_v1  ;;  %v867_v3 = vpop.f32.mrf.mxu0  ;;  %v947_v4 = vpop.f32.mrf.mxu1 }
 0x116   : > { %1261 = vst.msk [vmem:[%s1884_s27 + $0x370] sm:$0xff] %vm1150_vm2, %v1105_v2 }
 0x117   : > { %1166 = vst.msk [vmem:[%s1884_s27 + $0x78] sm:$0xff] %vm1150_vm2, %v867_v3 }
 0x118   : > { %1198 = vst.msk [vmem:[%s1884_s27 + $0x178] sm:$0xff] %vm1150_vm2, %v947_v4 }
 0x11c   : > { %v1027_v5 = vpop.f32.mrf.mxu2  ;;  %v1107_v6 = vpop.f32.mrf.mxu3 }
 0x11d   : > { %1230 = vst.msk [vmem:[%s1884_s27 + $0x278] sm:$0xff] %vm1150_vm2, %v1027_v5  ;;  %v870_v7 = vpop.f32.mrf.mxu0  ;;  %v950_v8 = vpop.f32.mrf.mxu1 }
 0x11e   : > { %1262 = vst.msk [vmem:[%s1884_s27 + $0x378] sm:$0xff] %vm1150_vm2, %v1107_v6 }
 0x11f   : > { %1167 = vst.msk [vmem:[%s1884_s27 + $0x80] sm:$0xff] %vm1150_vm2, %v870_v7 }
 0x120   : > { %1199 = vst.msk [vmem:[%s1884_s27 + $0x180] sm:$0xff] %vm1150_vm2, %v950_v8 }
 0x124   : > { %v1030_v9 = vpop.f32.mrf.mxu2  ;;  %v1110_v10 = vpop.f32.mrf.mxu3 }
 0x125   : > { %1231 = vst.msk [vmem:[%s1884_s27 + $0x280] sm:$0xff] %vm1150_vm2, %v1030_v9  ;;  %v872_v11 = vpop.f32.mrf.mxu0  ;;  %v952_v12 = vpop.f32.mrf.mxu1 }
 0x126   : > { %1263 = vst.msk [vmem:[%s1884_s27 + $0x380] sm:$0xff] %vm1150_vm2, %v1110_v10 }
 0x127   : > { %1168 = vst.msk [vmem:[%s1884_s27 + $0x88] sm:$0xff] %vm1150_vm2, %v872_v11 }
 0x128   : > { %1200 = vst.msk [vmem:[%s1884_s27 + $0x188] sm:$0xff] %vm1150_vm2, %v952_v12 }
 0x12c   : > { %v1032_v13 = vpop.f32.mrf.mxu2  ;;  %v1112_v14 = vpop.f32.mrf.mxu3 }
 0x12d   : > { %1232 = vst.msk [vmem:[%s1884_s27 + $0x288] sm:$0xff] %vm1150_vm2, %v1032_v13  ;;  %v875_v15 = vpop.f32.mrf.mxu0  ;;  %v955_v16 = vpop.f32.mrf.mxu1 }
 0x12e   : > { %1264 = vst.msk [vmem:[%s1884_s27 + $0x388] sm:$0xff] %vm1150_vm2, %v1112_v14 }
 0x12f   : > { %1169 = vst.msk [vmem:[%s1884_s27 + $0x90] sm:$0xff] %vm1150_vm2, %v875_v15 }
 0x130   : > { %1201 = vst.msk [vmem:[%s1884_s27 + $0x190] sm:$0xff] %vm1150_vm2, %v955_v16 }
 0x134   : > { %v1035_v17 = vpop.f32.mrf.mxu2  ;;  %v1115_v18 = vpop.f32.mrf.mxu3 }
 0x135   : > { %1233 = vst.msk [vmem:[%s1884_s27 + $0x290] sm:$0xff] %vm1150_vm2, %v1035_v17  ;;  %v877_v19 = vpop.f32.mrf.mxu0  ;;  %v957_v20 = vpop.f32.mrf.mxu1 }
 0x136   : > { %1265 = vst.msk [vmem:[%s1884_s27 + $0x390] sm:$0xff] %vm1150_vm2, %v1115_v18 }
 0x137   : > { %1170 = vst.msk [vmem:[%s1884_s27 + $0x98] sm:$0xff] %vm1150_vm2, %v877_v19 }
 0x138   : > { %1202 = vst.msk [vmem:[%s1884_s27 + $0x198] sm:$0xff] %vm1150_vm2, %v957_v20 }
 0x13c   : > { %v1037_v21 = vpop.f32.mrf.mxu2  ;;  %v1117_v22 = vpop.f32.mrf.mxu3 }
 0x13d   : > { %1234 = vst.msk [vmem:[%s1884_s27 + $0x298] sm:$0xff] %vm1150_vm2, %v1037_v21  ;;  %v880_v23 = vpop.f32.mrf.mxu0  ;;  %v960_v24 = vpop.f32.mrf.mxu1 }
 0x13e   : > { %1266 = vst.msk [vmem:[%s1884_s27 + $0x398] sm:$0xff] %vm1150_vm2, %v1117_v22 }
 0x13f   : > { %1171 = vst.msk [vmem:[%s1884_s27 + $0xa0] sm:$0xff] %vm1150_vm2, %v880_v23 }
 0x140   : > { %1203 = vst.msk [vmem:[%s1884_s27 + $0x1a0] sm:$0xff] %vm1150_vm2, %v960_v24 }
 0x144   : > { %v1040_v25 = vpop.f32.mrf.mxu2  ;;  %v1120_v26 = vpop.f32.mrf.mxu3 }
 0x145   : > { %1235 = vst.msk [vmem:[%s1884_s27 + $0x2a0] sm:$0xff] %vm1150_vm2, %v1040_v25  ;;  %v882_v27 = vpop.f32.mrf.mxu0  ;;  %v962_v28 = vpop.f32.mrf.mxu1 }
 0x146   : > { %1267 = vst.msk [vmem:[%s1884_s27 + $0x3a0] sm:$0xff] %vm1150_vm2, %v1120_v26 }
 0x147   : > { %1172 = vst.msk [vmem:[%s1884_s27 + $0xa8] sm:$0xff] %vm1150_vm2, %v882_v27 }
 0x148   : > { %1204 = vst.msk [vmem:[%s1884_s27 + $0x1a8] sm:$0xff] %vm1150_vm2, %v962_v28 }
 0x14c   : > { %v1042_v29 = vpop.f32.mrf.mxu2  ;;  %v1122_v30 = vpop.f32.mrf.mxu3 }
 0x14d   : > { %1236 = vst.msk [vmem:[%s1884_s27 + $0x2a8] sm:$0xff] %vm1150_vm2, %v1042_v29  ;;  %v885_v31 = vpop.f32.mrf.mxu0  ;;  %v965_v32 = vpop.f32.mrf.mxu1 }
 0x14e   : > { %1268 = vst.msk [vmem:[%s1884_s27 + $0x3a8] sm:$0xff] %vm1150_vm2, %v1122_v30 }
 0x14f   : > { %1173 = vst.msk [vmem:[%s1884_s27 + $0xb0] sm:$0xff] %vm1150_vm2, %v885_v31 }
 0x150   : > { %1205 = vst.msk [vmem:[%s1884_s27 + $0x1b0] sm:$0xff] %vm1150_vm2, %v965_v32 }
 0x154   : > { %v1045_v33 = vpop.f32.mrf.mxu2  ;;  %v1125_v34 = vpop.f32.mrf.mxu3 }
 0x155   : > { %1237 = vst.msk [vmem:[%s1884_s27 + $0x2b0] sm:$0xff] %vm1150_vm2, %v1045_v33  ;;  %v887_v35 = vpop.f32.mrf.mxu0  ;;  %v967_v36 = vpop.f32.mrf.mxu1 }
 0x156   : > { %1269 = vst.msk [vmem:[%s1884_s27 + $0x3b0] sm:$0xff] %vm1150_vm2, %v1125_v34 }
 0x157   : > { %1174 = vst.msk [vmem:[%s1884_s27 + $0xb8] sm:$0xff] %vm1150_vm2, %v887_v35 }
 0x158   : > { %1206 = vst.msk [vmem:[%s1884_s27 + $0x1b8] sm:$0xff] %vm1150_vm2, %v967_v36 }
 0x15c   : > { %v1047_v37 = vpop.f32.mrf.mxu2  ;;  %v1127_v38 = vpop.f32.mrf.mxu3 }
 0x15d   : > { %1238 = vst.msk [vmem:[%s1884_s27 + $0x2b8] sm:$0xff] %vm1150_vm2, %v1047_v37  ;;  %v890_v39 = vpop.f32.mrf.mxu0  ;;  %v970_v40 = vpop.f32.mrf.mxu1 }
 0x15e   : > { %1270 = vst.msk [vmem:[%s1884_s27 + $0x3b8] sm:$0xff] %vm1150_vm2, %v1127_v38 }
 0x15f   : > { %1175 = vst.msk [vmem:[%s1884_s27 + $0xc0] sm:$0xff] %vm1150_vm2, %v890_v39 }
 0x160   : > { %1207 = vst.msk [vmem:[%s1884_s27 + $0x1c0] sm:$0xff] %vm1150_vm2, %v970_v40 }
 0x164   : > { %v1050_v41 = vpop.f32.mrf.mxu2  ;;  %v1130_v42 = vpop.f32.mrf.mxu3 }
 0x165   : > { %1239 = vst.msk [vmem:[%s1884_s27 + $0x2c0] sm:$0xff] %vm1150_vm2, %v1050_v41  ;;  %v892_v43 = vpop.f32.mrf.mxu0  ;;  %v972_v44 = vpop.f32.mrf.mxu1 }
 0x166   : > { %1271 = vst.msk [vmem:[%s1884_s27 + $0x3c0] sm:$0xff] %vm1150_vm2, %v1130_v42 }
 0x167   : > { %1176 = vst.msk [vmem:[%s1884_s27 + $0xc8] sm:$0xff] %vm1150_vm2, %v892_v43 }
 0x168   : > { %1208 = vst.msk [vmem:[%s1884_s27 + $0x1c8] sm:$0xff] %vm1150_vm2, %v972_v44 }
 0x16c   : > { %v1052_v45 = vpop.f32.mrf.mxu2  ;;  %v1132_v46 = vpop.f32.mrf.mxu3 }
 0x16d   : > { %1240 = vst.msk [vmem:[%s1884_s27 + $0x2c8] sm:$0xff] %vm1150_vm2, %v1052_v45  ;;  %v895_v47 = vpop.f32.mrf.mxu0  ;;  %v975_v48 = vpop.f32.mrf.mxu1 }
 0x16e   : > { %1272 = vst.msk [vmem:[%s1884_s27 + $0x3c8] sm:$0xff] %vm1150_vm2, %v1132_v46 }
 0x16f   : > { %1177 = vst.msk [vmem:[%s1884_s27 + $0xd0] sm:$0xff] %vm1150_vm2, %v895_v47 }
 0x170   : > { %1209 = vst.msk [vmem:[%s1884_s27 + $0x1d0] sm:$0xff] %vm1150_vm2, %v975_v48 }
 0x174   : > { %v1055_v49 = vpop.f32.mrf.mxu2  ;;  %v1135_v50 = vpop.f32.mrf.mxu3 }
 0x175   : > { %1241 = vst.msk [vmem:[%s1884_s27 + $0x2d0] sm:$0xff] %vm1150_vm2, %v1055_v49  ;;  %v897_v51 = vpop.f32.mrf.mxu0  ;;  %v977_v52 = vpop.f32.mrf.mxu1 }
 0x176   : > { %1273 = vst.msk [vmem:[%s1884_s27 + $0x3d0] sm:$0xff] %vm1150_vm2, %v1135_v50 }
 0x177   : > { %1178 = vst.msk [vmem:[%s1884_s27 + $0xd8] sm:$0xff] %vm1150_vm2, %v897_v51 }
 0x178   : > { %1210 = vst.msk [vmem:[%s1884_s27 + $0x1d8] sm:$0xff] %vm1150_vm2, %v977_v52 }
 0x17c   : > { %v1057_v53 = vpop.f32.mrf.mxu2  ;;  %v1137_v54 = vpop.f32.mrf.mxu3 }
 0x17d   : > { %1242 = vst.msk [vmem:[%s1884_s27 + $0x2d8] sm:$0xff] %vm1150_vm2, %v1057_v53  ;;  %v900_v55 = vpop.f32.mrf.mxu0  ;;  %v980_v56 = vpop.f32.mrf.mxu1 }
 0x17e   : > { %1274 = vst.msk [vmem:[%s1884_s27 + $0x3d8] sm:$0xff] %vm1150_vm2, %v1137_v54 }
 0x17f   : > { %1179 = vst.msk [vmem:[%s1884_s27 + $0xe0] sm:$0xff] %vm1150_vm2, %v900_v55 }
 0x180   : > { %1211 = vst.msk [vmem:[%s1884_s27 + $0x1e0] sm:$0xff] %vm1150_vm2, %v980_v56 }
 0x184   : > { %v1060_v57 = vpop.f32.mrf.mxu2  ;;  %v1140_v58 = vpop.f32.mrf.mxu3 }
 0x185   : > { %1243 = vst.msk [vmem:[%s1884_s27 + $0x2e0] sm:$0xff] %vm1150_vm2, %v1060_v57  ;;  %v902_v59 = vpop.f32.mrf.mxu0  ;;  %v982_v60 = vpop.f32.mrf.mxu1 }
 0x186   : > { %1275 = vst.msk [vmem:[%s1884_s27 + $0x3e0] sm:$0xff] %vm1150_vm2, %v1140_v58 }
 0x187   : > { %1180 = vst.msk [vmem:[%s1884_s27 + $0xe8] sm:$0xff] %vm1150_vm2, %v902_v59 }
 0x188   : > { %1212 = vst.msk [vmem:[%s1884_s27 + $0x1e8] sm:$0xff] %vm1150_vm2, %v982_v60 }
 0x18c   : > { %v1062_v61 = vpop.f32.mrf.mxu2  ;;  %v1142_v62 = vpop.f32.mrf.mxu3 }
 0x18d   : > { %1244 = vst.msk [vmem:[%s1884_s27 + $0x2e8] sm:$0xff] %vm1150_vm2, %v1062_v61  ;;  %v905_v63 = vpop.f32.mrf.mxu0  ;;  %v985_v0 = vpop.f32.mrf.mxu1 }
 0x18e   : > { %1276 = vst.msk [vmem:[%s1884_s27 + $0x3e8] sm:$0xff] %vm1150_vm2, %v1142_v62 }
 0x18f   : > { %1181 = vst.msk [vmem:[%s1884_s27 + $0xf0] sm:$0xff] %vm1150_vm2, %v905_v63 }
 0x190   : > { %1213 = vst.msk [vmem:[%s1884_s27 + $0x1f0] sm:$0xff] %vm1150_vm2, %v985_v0 }
 0x194   : > { %v1065_v1 = vpop.f32.mrf.mxu2  ;;  %v1145_v2 = vpop.f32.mrf.mxu3 }
 0x195   : > { %1245 = vst.msk [vmem:[%s1884_s27 + $0x2f0] sm:$0xff] %vm1150_vm2, %v1065_v1  ;;  %v907_v3 = vpop.f32.mrf.mxu0  ;;  %v987_v4 = vpop.f32.mrf.mxu1 }
 0x196   : > { %1277 = vst.msk [vmem:[%s1884_s27 + $0x3f0] sm:$0xff] %vm1150_vm2, %v1145_v2 }
 0x197   : > { %1182 = vst.msk [vmem:[%s1884_s27 + $0xf8] sm:$0xff] %vm1150_vm2, %v907_v3 }
 0x198   : > { %1214 = vst.msk [vmem:[%s1884_s27 + $0x1f8] sm:$0xff] %vm1150_vm2, %v987_v4 }
 0x19c   : > { %v1067_v5 = vpop.f32.mrf.mxu2  ;;  %v1147_v6 = vpop.f32.mrf.mxu3 }
 0x19d   : > { %1246 = vst.msk [vmem:[%s1884_s27 + $0x2f8] sm:$0xff] %vm1150_vm2, %v1067_v5 }
 0x19e   : > { %1278 = vst.msk [vmem:[%s1884_s27 + $0x3f8] sm:$0xff] %vm1150_vm2, %v1147_v6 }
 0x19f PF: > { %s12_s9 = sadd.s32 1, %s1771_s9  }
 0x1a0   : > { %p9_p4 = scmp.ge.s32.totalorder %s12_s9, 6  }
 0x1a2   :  { %11 = sbr.rel (!%p9_p4) target bundleno = 1 (0x1), region = 58 }

</bundles_post_ra>
